<compile_context>
chip_gen: v6e
topology: v6e:2x2x1
jax: 0.10.0
libtpu: 0.0.40
codegen_flags: <defaults>
</compile_context>

<pallas_src>
import jax
import jax.numpy as jnp
from jax.experimental import pallas as pl
from jax.experimental.pallas import tpu as pltpu


def _round_up(x, m):
    return (x + m - 1) // m * m


def _critic_kernel(x_ref, w1_ref, b1_ref, w2_ref, b2_ref, w3_ref, b3_ref, o_ref):
    """One batch tile of the fused critic MLP.

    x_ref : (TM, state_dim) f32/bf16  w1_ref: (state_dim, H) bf16   b1_ref: (1, H) f32
    w2_ref: (H, H) bf16               b2_ref: (1, H) f32
    w3_ref: (1, H) bf16 (head row)    b3_ref: (1, 1) f32 in SMEM
    o_ref : (TM, 1) f32
    """
    # Cast the input tile to the weight dtype in-kernel (VPU) -> MXU bf16 path
    # with f32 accumulation.  Reading x in its native dtype avoids a separate
    # XLA cast pass over the whole input in HBM.
    x = x_ref[...].astype(w1_ref.dtype)

    # Layer 1.
    h1 = jnp.dot(x, w1_ref[...], preferred_element_type=jnp.float32) + b1_ref[...]
    h1 = jnp.maximum(h1, 0.0)

    # Layer 2.
    h2 = jnp.dot(h1.astype(w2_ref.dtype), w2_ref[...],
                 preferred_element_type=jnp.float32) + b2_ref[...]
    h2 = jnp.maximum(h2, 0.0)

    # Value head (128 -> 1): an N=1 matmul wastes the MXU; do it as a VPU
    # multiply + lane reduction (XLU) — those slots are otherwise idle here.
    w3_row = w3_ref[...].astype(jnp.float32)             # (1, H), broadcasts over TM
    v = jnp.sum(h2 * w3_row, axis=-1, keepdims=True) + b3_ref[0, 0]
    o_ref[...] = v.astype(o_ref.dtype)                   # (TM, 1) narrow store — tiny bytes


def _reference(s, params):
    """Pure-XLA reference with identical dtype handling (bf16 ops, f32 accum)."""
    w1, b1, w2, b2, w3_row, b3 = params
    x = s.astype(w1.dtype)
    h1 = jnp.maximum(jnp.dot(x, w1, preferred_element_type=jnp.float32) + b1, 0.0)
    h2 = jnp.maximum(jnp.dot(h1.astype(w2.dtype), w2,
                             preferred_element_type=jnp.float32) + b2, 0.0)
    return jnp.sum(h2 * w3_row.astype(jnp.float32), axis=-1, keepdims=True) + b3[0, 0]


def critic_forward(s, params, *, tm=1024, min_pallas_batch=64):
    """s: [B, state_dim].  Returns value estimates [B, 1] (float32)."""
    w1, b1, w2, b2, w3_row, b3 = params
    B, state_dim = s.shape
    hidden = w1.shape[1]

    # Launch-overhead-bound regime: plain XLA fusion is as fast or faster.
    if B < min_pallas_batch:
        return _reference(s, params)

    # Batch tile: multiple of 8 (sublanes).  Ragged edges are handled by the
    # cdiv grid (OOB reads are garbage but stay in their own rows; OOB writes
    # are masked), so no jnp.pad / slice copies are needed.
    tm = min(tm, _round_up(B, 8))
    grid = (pl.cdiv(B, tm),)

    xbytes = jnp.dtype(s.dtype).itemsize
    wbytes = jnp.dtype(w1.dtype).itemsize
    cost = pl.CostEstimate(
        flops=2 * B * (state_dim * hidden + hidden * hidden + hidden),
        transcendentals=0,
        bytes_accessed=(B * state_dim * xbytes             # x in
                        + B * 4                            # out
                        + (state_dim * hidden + hidden * hidden + hidden) * wbytes
                        + (2 * hidden + 1) * 4),           # biases
    )

    out = pl.pallas_call(
        _critic_kernel,
        out_shape=jax.ShapeDtypeStruct((B, 1), jnp.float32),
        grid=grid,
        in_specs=[
            pl.BlockSpec((tm, state_dim), lambda i: (i, 0)),      # x: batch-tiled
            pl.BlockSpec((state_dim, hidden), lambda i: (0, 0)),  # w1 (resident)
            pl.BlockSpec((1, hidden), lambda i: (0, 0)),          # b1 (resident)
            pl.BlockSpec((hidden, hidden), lambda i: (0, 0)),     # w2 (resident)
            pl.BlockSpec((1, hidden), lambda i: (0, 0)),          # b2 (resident)
            pl.BlockSpec((1, hidden), lambda i: (0, 0)),          # w3 row (resident)
            pl.BlockSpec(memory_space=pltpu.MemorySpace.SMEM),    # b3 scalar
        ],
        out_specs=pl.BlockSpec((tm, 1), lambda i: (i, 0)),
        compiler_params=pltpu.CompilerParams(
            dimension_semantics=("parallel",)),
        cost_estimate=cost,
    )(s, w1, b1, w2, b2, w3_row, b3)

    return out


def init_params(key, state_dim=32, hidden=128, param_dtype=jnp.bfloat16):
    """Deterministic synthetic parameters (uniform fan-in init, like torch Linear).

    Weights are stored in bf16 (half the HBM/VMEM bytes, bf16 MXU path);
    biases stay f32.  The head weight is stored as a (1, hidden) row for the
    VPU reduction in the kernel.
    """
    ks = jax.random.split(key, 6)

    def linear(kw, kb, fan_in, fan_out):
        bound = float(fan_in) ** -0.5
        w = jax.random.uniform(kw, (fan_in, fan_out), jnp.float32, -bound, bound)
        b = jax.random.uniform(kb, (1, fan_out), jnp.float32, -bound, bound)
        return w, b

    w1, b1 = linear(ks[0], ks[1], state_dim, hidden)
    w2, b2 = linear(ks[2], ks[3], hidden, hidden)
    w3, b3 = linear(ks[4], ks[5], hidden, 1)
    w3_row = w3.T  # (1, hidden) row for the lane reduction; b3 stays (1, 1) f32
    return (w1.astype(param_dtype), b1,
            w2.astype(param_dtype), b2,
            w3_row.astype(param_dtype), b3)


if __name__ == "__main__":
    key = jax.random.PRNGKey(0)
    k_params, k_s = jax.random.split(key)

    STATE_DIM, HIDDEN = 32, 128
    params = init_params(k_params, STATE_DIM, HIDDEN)

    # Even case: tm=128 -> grid=(2,), exercises the tiled, pipelined path.
    B = 256
    s = jax.random.normal(k_s, (B, STATE_DIM), jnp.float32)
    out = jax.block_until_ready(critic_forward(s, params, tm=128))
    ref = _reference(s, params)
    assert out.shape == (B, 1)
    assert jnp.allclose(out, ref, atol=2e-3, rtol=2e-3)

    # Uneven case: B not a multiple of tm -> masked edge block, no padding copies.
    B2 = 200
    s2 = s[:B2]
    out2 = jax.block_until_ready(critic_forward(s2, params, tm=128))
    ref2 = _reference(s2, params)
    assert out2.shape == (B2, 1)
    assert jnp.allclose(out2, ref2, atol=2e-3, rtol=2e-3)

    print("KERNEL_OK")
</pallas_src>

<mosaic_0001>
module attributes {stable_mosaic.version = 11 : i64} {
  func.func @_critic_kernel(%arg0: i32, %arg1: memref<128x32xf32, #tpu.memory_space<vmem>>, %arg2: memref<32x128xbf16, #tpu.memory_space<vmem>>, %arg3: memref<1x128xf32, #tpu.memory_space<vmem>>, %arg4: memref<128x128xbf16, #tpu.memory_space<vmem>>, %arg5: memref<1x128xf32, #tpu.memory_space<vmem>>, %arg6: memref<1x128xbf16, #tpu.memory_space<vmem>>, %arg7: memref<1x1xf32, #tpu.memory_space<smem>>, %arg8: memref<128x1xf32, #tpu.memory_space<vmem>>) attributes {dimension_semantics = [#tpu.dimension_semantics<parallel>], iteration_bounds = array<i64: 2>, scalar_prefetch = 0 : i64, scratch_operands = 0 : i64, tpu.core_type = #tpu.core_type<tc>, window_params = [{transform_indices = @transform_0, window_bounds = array<i64: 128, 32>}, {pipeline_mode = #tpu.pipeline_mode<synchronous>, transform_indices = @transform_1, window_bounds = array<i64: 32, 128>}, {pipeline_mode = #tpu.pipeline_mode<synchronous>, transform_indices = @transform_2, window_bounds = array<i64: 1, 128>}, {pipeline_mode = #tpu.pipeline_mode<synchronous>, transform_indices = @transform_3, window_bounds = array<i64: 128, 128>}, {pipeline_mode = #tpu.pipeline_mode<synchronous>, transform_indices = @transform_4, window_bounds = array<i64: 1, 128>}, {pipeline_mode = #tpu.pipeline_mode<synchronous>, transform_indices = @transform_5, window_bounds = array<i64: 1, 128>}, {transform_indices = @transform_6, window_bounds = array<i64: 1, 1>}, {transform_indices = @transform_7, window_bounds = array<i64: 128, 1>}]} {
    %c0 = arith.constant 0 : index
    %c0_0 = arith.constant 0 : index
    %0 = vector.load %arg1[%c0, %c0_0] : memref<128x32xf32, #tpu.memory_space<vmem>>, vector<128x32xf32>
    %1 = arith.truncf %0 : vector<128x32xf32> to vector<128x32xbf16>
    %c0_1 = arith.constant 0 : index
    %c0_2 = arith.constant 0 : index
    %2 = vector.load %arg2[%c0_1, %c0_2] : memref<32x128xbf16, #tpu.memory_space<vmem>>, vector<32x128xbf16>
    %cst = arith.constant dense<0.000000e+00> : vector<128x128xf32>
    %3 = tpu.matmul %1, %2, %cst {dimension_numbers = #tpu.dot_dimension_numbers<[1], [0], [0], [1], [0, 0, 1, 1], [], []>} : vector<128x32xbf16>, vector<32x128xbf16>, vector<128x128xf32> -> vector<128x128xf32>
    %c0_3 = arith.constant 0 : index
    %c0_4 = arith.constant 0 : index
    %4 = vector.load %arg3[%c0_3, %c0_4] : memref<1x128xf32, #tpu.memory_space<vmem>>, vector<1x128xf32>
    %5 = vector.broadcast %4 : vector<1x128xf32> to vector<128x128xf32>
    %6 = arith.addf %3, %5 : vector<128x128xf32>
    %cst_5 = arith.constant 0.000000e+00 : f32
    %7 = vector.broadcast %cst_5 : f32 to vector<128x128xf32>
    %8 = arith.maximumf %6, %7 : vector<128x128xf32>
    %9 = arith.truncf %8 : vector<128x128xf32> to vector<128x128xbf16>
    %c0_6 = arith.constant 0 : index
    %c0_7 = arith.constant 0 : index
    %10 = vector.load %arg4[%c0_6, %c0_7] : memref<128x128xbf16, #tpu.memory_space<vmem>>, vector<128x128xbf16>
    %cst_8 = arith.constant dense<0.000000e+00> : vector<128x128xf32>
    %11 = tpu.matmul %9, %10, %cst_8 {dimension_numbers = #tpu.dot_dimension_numbers<[1], [0], [0], [1], [0, 0, 1, 1], [], []>} : vector<128x128xbf16>, vector<128x128xbf16>, vector<128x128xf32> -> vector<128x128xf32>
    %c0_9 = arith.constant 0 : index
    %c0_10 = arith.constant 0 : index
    %12 = vector.load %arg5[%c0_9, %c0_10] : memref<1x128xf32, #tpu.memory_space<vmem>>, vector<1x128xf32>
    %13 = vector.broadcast %12 : vector<1x128xf32> to vector<128x128xf32>
    %14 = arith.addf %11, %13 : vector<128x128xf32>
    %cst_11 = arith.constant 0.000000e+00 : f32
    %15 = vector.broadcast %cst_11 : f32 to vector<128x128xf32>
    %16 = arith.maximumf %14, %15 : vector<128x128xf32>
    %c0_12 = arith.constant 0 : index
    %c0_13 = arith.constant 0 : index
    %17 = vector.load %arg6[%c0_12, %c0_13] : memref<1x128xbf16, #tpu.memory_space<vmem>>, vector<1x128xbf16>
    %18 = arith.extf %17 : vector<1x128xbf16> to vector<1x128xf32>
    %19 = vector.broadcast %18 : vector<1x128xf32> to vector<128x128xf32>
    %20 = arith.mulf %16, %19 : vector<128x128xf32>
    %cst_14 = arith.constant dense<0.000000e+00> : vector<128xf32>
    %21 = vector.multi_reduction <add>, %20, %cst_14 [1] : vector<128x128xf32> to vector<128xf32>
    %22 = vector.shape_cast %21 : vector<128xf32> to vector<128x1xf32>
    %c0_15 = arith.constant 0 : index
    %c0_16 = arith.constant 0 : index
    %23 = memref.load %arg7[%c0_15, %c0_16] : memref<1x1xf32, #tpu.memory_space<smem>>
    %24 = vector.broadcast %23 : f32 to vector<128x1xf32>
    %25 = arith.addf %22, %24 : vector<128x1xf32>
    %c0_17 = arith.constant 0 : index
    %c0_18 = arith.constant 0 : index
    %26 = vector.load %arg8[%c0_17, %c0_18] : memref<128x1xf32, #tpu.memory_space<vmem>>, vector<128x1xf32>
    tpu.vector_store %arg8[%c0_17, %c0_18], %25 {strides = array<i32>} : memref<128x1xf32, #tpu.memory_space<vmem>>, vector<128x1xf32>,
    return
  }
  func.func @transform_0(%arg0: i32) -> (i32, i32) {
    %c0_i32 = arith.constant 0 : i32
    %c0_i32_0 = arith.constant 0 : i32
    return %arg0, %c0_i32 : i32, i32
  }
  func.func @transform_1(%arg0: i32) -> (i32, i32) {
    %c0_i32 = arith.constant 0 : i32
    %c0_i32_0 = arith.constant 0 : i32
    %c0_i32_1 = arith.constant 0 : i32
    return %c0_i32, %c0_i32_0 : i32, i32
  }
  func.func @transform_2(%arg0: i32) -> (i32, i32) {
    %c0_i32 = arith.constant 0 : i32
    %c0_i32_0 = arith.constant 0 : i32
    %c0_i32_1 = arith.constant 0 : i32
    return %c0_i32, %c0_i32_0 : i32, i32
  }
  func.func @transform_3(%arg0: i32) -> (i32, i32) {
    %c0_i32 = arith.constant 0 : i32
    %c0_i32_0 = arith.constant 0 : i32
    %c0_i32_1 = arith.constant 0 : i32
    return %c0_i32, %c0_i32_0 : i32, i32
  }
  func.func @transform_4(%arg0: i32) -> (i32, i32) {
    %c0_i32 = arith.constant 0 : i32
    %c0_i32_0 = arith.constant 0 : i32
    %c0_i32_1 = arith.constant 0 : i32
    return %c0_i32, %c0_i32_0 : i32, i32
  }
  func.func @transform_5(%arg0: i32) -> (i32, i32) {
    %c0_i32 = arith.constant 0 : i32
    %c0_i32_0 = arith.constant 0 : i32
    %c0_i32_1 = arith.constant 0 : i32
    return %c0_i32, %c0_i32_0 : i32, i32
  }
  func.func @transform_6(%arg0: i32) -> (i32, i32) {
    %c0_i32 = arith.constant 0 : i32
    %c0_i32_0 = arith.constant 0 : i32
    %c0_i32_1 = arith.constant 0 : i32
    return %c0_i32, %c0_i32_0 : i32, i32
  }
  func.func @transform_7(%arg0: i32) -> (i32, i32) {
    %c0_i32 = arith.constant 0 : i32
    %c0_i32_0 = arith.constant 0 : i32
    return %arg0, %c0_i32 : i32, i32
  }
}

</mosaic_0001>

<bundles_post_ra>
// kernel: tpu_custom_call.1
= control target key start
LH: loop header
LB: loop body
LE: loop exit
PB: predicated region body
PF: predicated region fallthrough
CT: control target
= control target key end

     0   :  { %s1000_s26 = smov 0   ;;  %s1159_s0 = inlined_call_operand.vmem [shape: f32[256,32], index: 0, kind: input, shape index: {}]   ;;  %s1160_s1 = inlined_call_operand.vmem [shape: bf16[32,128], index: 1, kind: input, shape index: {}]   ;;  %s1161_s2 = inlined_call_operand.vmem [shape: f32[1,128], index: 2, kind: input, shape index: {}]   ;;  %s1162_s3 = inlined_call_operand.vmem [shape: bf16[128,128], index: 3, kind: input, shape index: {}]   ;;  %s1163_s4 = inlined_call_operand.vmem [shape: f32[1,128], index: 4, kind: input, shape index: {}]   ;;  %s1164_s5 = inlined_call_operand.vmem [shape: bf16[1,128], index: 5, kind: input, shape index: {}]   ;;  %s1165_s6 = inlined_call_operand.<no memory space> [shape: f32[1,1], index: 6, kind: input, shape index: {}]   ;;  %s1166_s7 = inlined_call_operand.vmem [shape: f32[256,1], index: 7, kind: output, shape index: {}]  }
   0x1   :  { %12 = sst [smem:[#allocation2]] %s1165_s6 }
   0x2 LB: > { %s806_s27 = sadd.s32 4294967295, %s955_s26   ;;  %p810_p0 = scmp.ge.s32.totalorder %s955_s26, 1  ;;  %s955_s26 = sphi %s1000_s26, %s18_s26  }
   0x3   : > { %p239_p1 = scmp.lt.s32.totalorder %s955_s26, 3 }
   0x5   : > { %p240_p2 = pnand %p810_p0, %p239_p1 }
   0x6   : > { %s811_s6 = sshll.u32 (!%p240_p2), %s806_s27, 4  ;;  %s715_s14 = sld [smem:[#allocation2]] (!%p240_p2) }
   0x7   : > { %243 = sbr.rel (%p240_p2) target bundleno = 601 (0x259), region = 48  ;;  %p272_p3 = scmp.lt.s32.totalorder (!%p240_p2), %s811_s6, 31 }
   0xc   : > { %v939_v0 = vld [vmem:[%s1160_s1 + $0x8] sm:$0xff]   ;;  %v940_v1 = vld [vmem:[%s1160_s1] sm:$0xff]   ;;  %v941_v2 = vld [vmem:[%s1162_s3 + $0x38] sm:$0xff]   ;;  %s1168_s6 = smov (!%p272_p3, %s811_s6), 31  ;;  %vm331_vm0 = vcmask 261120   ;;  %vm733_vm1 = vcmask 7168  }
   0xd   : > { %863 = vmatprep.subr.bf16.mxu0 %v939_v0  ;;  %v942_v3 = vld [vmem:[%s1162_s3 + $0x30] sm:$0xff]   ;;  %915 = vmatprep.subr.bf16.mxu1 %v941_v2  ;;  %s812_s13 = sshll.u32 %s1168_s6, 3  ;;  %v943_v4 = vld [vmem:[%s1162_s3 + $0x28] sm:$0xff]   ;;  %v944_v14 = vld [vmem:[%s1162_s3 + $0x20] sm:$0xff]  }
   0xe   : > { %864 = vmatpush3.bf16.msra.mxu0 %v939_v0  ;;  %923 = vmatpush3.bf16.msra.mxu1 %v941_v2  ;;  %s1028_s16 = scalar_lea.vmem %s1159_s0, %s812_s13  ;;  %v945_v21 = vld [vmem:[%s1162_s3 + $0x18] sm:$0xff]   ;;  %v946_v31 = vld [vmem:[%s1162_s3 + $0x10] sm:$0xff]   ;;  %v947_v32 = vld [vmem:[%s1162_s3 + $0x8] sm:$0xff]   ;;  %s1122_s17 = scalar_lea.vmem %s1166_s7, %s812_s13 }
   0xf   : > { %865 = vmatprep.subr.bf16.mxu0 %v940_v1  ;;  %916 = vmatprep.subr.bf16.mxu1 %v942_v3  ;;  %v284_v5 = vld [vmem:[%s1028_s16] sm:$0xff]  ;;  %v285_v6 = vld [vmem:[%s1028_s16 + $0x8] sm:$0xff]  ;;  %v286_v7 = vld [vmem:[%s1028_s16 + $0x10] sm:$0xff] }
  0x10   : > { %v300_v8 = vpack.c.bf16 %v285_v6, %v284_v5  ;;  %v287_v9 = vld [vmem:[%s1028_s16 + $0x18] sm:$0xff]  ;;  %v288_v10 = vld [vmem:[%s1028_s16 + $0x20] sm:$0xff]  ;;  %v289_v11 = vld [vmem:[%s1028_s16 + $0x28] sm:$0xff] }
  0x11   : > { %v301_v12 = vpack.c.bf16 %v287_v9, %v286_v7  ;;  %v302_v13 = vpack.c.bf16 %v289_v11, %v288_v10  ;;  %v290_v15 = vld [vmem:[%s1028_s16 + $0x30] sm:$0xff]  ;;  %v291_v16 = vld [vmem:[%s1028_s16 + $0x38] sm:$0xff]  ;;  %v292_v17 = vld [vmem:[%s1028_s16 + $0x40] sm:$0xff] }
  0x12   : > { %866 = vmatpush3.bf16.msra.mxu0 %v940_v1  ;;  %924 = vmatpush3.bf16.msra.mxu1 %v942_v3  ;;  %v293_v18 = vld [vmem:[%s1028_s16 + $0x48] sm:$0xff]  ;;  %v303_v19 = vpack.c.bf16 %v291_v16, %v290_v15  ;;  %v294_v22 = vld [vmem:[%s1028_s16 + $0x50] sm:$0xff]  ;;  %v295_v23 = vld [vmem:[%s1028_s16 + $0x58] sm:$0xff] }
  0x13   : > { %883 = vmatprep.subr.bf16.mxu0 %v941_v2  ;;  %867 = vmatprep.mubr.msk.bf16.mxu0 %vm331_vm0, %v300_v8  ;;  %v304_v20 = vpack.c.bf16 %v293_v18, %v292_v17  ;;  %v296_v24 = vld [vmem:[%s1028_s16 + $0x60] sm:$0xff]  ;;  %v297_v25 = vld [vmem:[%s1028_s16 + $0x68] sm:$0xff]  ;;  %v305_v26 = vpack.c.bf16 %v295_v23, %v294_v22  ;;  %v298_v28 = vld [vmem:[%s1028_s16 + $0x70] sm:$0xff] }
  0x14   : > { %917 = vmatprep.subr.bf16.mxu1 %v943_v4  ;;  %v306_v27 = vpack.c.bf16 %v297_v25, %v296_v24  ;;  %v299_v29 = vld [vmem:[%s1028_s16 + $0x78] sm:$0xff]  ;;  %v948_v33 = vld [vmem:[%s1162_s3] sm:$0xff]  }
  0x15   : > { %868 = vmatmul.mubr.msk.bf16.vlgmr.msra.gmra.mxu0 %vm331_vm0, %v301_v12  ;;  %v307_v30 = vpack.c.bf16 %v299_v29, %v298_v28  ;;  %v815_v36 = vld [vmem:[%s1161_s2] ss:$0 sm:$0xff] }
  0x16   : > { %871 = vmatprep.mubr.msk.bf16.mxu0 %vm331_vm0, %v302_v13  ;;  %884 = vmatpush3.bf16.msra.mxu0 %v941_v2  ;;  %v661_v29 = vld [vmem:[%s1164_s5] sm:$0x1] }
  0x17   : > { %885 = vmatprep.subr.bf16.mxu0 %v942_v3  ;;  %925 = vmatpush3.bf16.msra.mxu1 %v943_v4 }
  0x18   : > { %918 = vmatprep.subr.bf16.mxu1 %v944_v14 }
  0x1a   : > { %886 = vmatpush3.bf16.msra.mxu0 %v942_v3 }
  0x1b   : > { %887 = vmatprep.subr.bf16.mxu0 %v943_v4  ;;  %926 = vmatpush3.bf16.msra.mxu1 %v944_v14 }
  0x1c   : > { %919 = vmatprep.subr.bf16.mxu1 %v945_v21 }
  0x1d   : > { %872 = vmatmul.mubr.msk.bf16.gmra.mxu0 %vm331_vm0, %v303_v19 }
  0x1e   : > { %875 = vmatprep.mubr.msk.bf16.mxu0 %vm331_vm0, %v304_v20  ;;  %888 = vmatpush3.bf16.msra.mxu0 %v943_v4 }
  0x1f   : > { %889 = vmatprep.subr.bf16.mxu0 %v944_v14  ;;  %927 = vmatpush3.bf16.msra.mxu1 %v945_v21 }
  0x20   : > { %920 = vmatprep.subr.bf16.mxu1 %v946_v31 }
  0x22   : > { %890 = vmatpush3.bf16.msra.mxu0 %v944_v14 }
  0x23   : > { %891 = vmatprep.subr.bf16.mxu0 %v945_v21  ;;  %928 = vmatpush3.bf16.msra.mxu1 %v946_v31 }
  0x24   : > { %921 = vmatprep.subr.bf16.mxu1 %v947_v32 }
  0x25   : > { %876 = vmatmul.mubr.msk.bf16.gmra.mxu0 %vm331_vm0, %v305_v26 }
  0x26   : > { %879 = vmatprep.mubr.msk.bf16.mxu0 %vm331_vm0, %v306_v27  ;;  %892 = vmatpush3.bf16.msra.mxu0 %v945_v21  ;;  %v663_v27 = vlaneseq }
  0x27   : > { %893 = vmatprep.subr.bf16.mxu0 %v946_v31  ;;  %929 = vmatpush3.bf16.msra.mxu1 %v947_v32 }
  0x28   : > { %922 = vmatprep.subr.bf16.mxu1 %v948_v33  ;;  %v664_v28 = vshrl.u32 %v663_v27, 7 }
  0x2a   : > { %894 = vmatpush3.bf16.msra.mxu0 %v946_v31  ;;  %v665_v31 = vsub.s32 0, %v664_v28 }
  0x2b   : > { %895 = vmatprep.subr.bf16.mxu0 %v947_v32  ;;  %930 = vmatpush3.bf16.msra.mxu1 %v948_v33 }
  0x2d   : > { %880 = vmatmul.mubr.msk.bf16.gmra.mxu0 %vm331_vm0, %v307_v30  ;;  %v662_v30 = vunpack.c.l.bf16 %v661_v29 }
  0x2e   : > { %896 = vmatpush3.bf16.msra.mxu0 %v947_v32  ;;  %v1081_v32 = vld [vmem:[%s1163_s4] ss:$0 sm:$0xff] }
  0x2f   : > { %897 = vmatprep.subr.bf16.mxu0 %v948_v33 }
  0x32   : > { %898 = vmatpush3.bf16.msra.mxu0 %v948_v33 }
  0xd5   : > { %v869_v34 = vpop.f32.mrf.mxu0 }
  0xd6   : > { %v399_v40 = vadd.f32 %v869_v34, %v815_v36 }
  0xd7   : > { %v390_v35 = vpop.f32.mrf.mxu0 }
  0xd8   : > { %v391_v38 = vadd.f32 %v815_v36, %v390_v35  ;;  %v455_v47 = vmax.f32 %v399_v40, 0.0  ;;  %v1084_v35 = vrot.slane %v662_v30, %v665_v31 }
  0xd9   : > { %v870_v37 = vpop.f32.mrf.mxu0 }
  0xda   : > { %v402_v39 = vadd.f32 %v870_v37, %v815_v36  ;;  %v453_v45 = vmax.f32 %v391_v38, 0.0 }
  0xdb   : > { %v393_v41 = vpop.f32.mrf.mxu0 }
  0xdc   : > { %v394_v42 = vadd.f32 %v815_v36, %v393_v41  ;;  %v456_v43 = vmax.f32 %v402_v39, 0.0 }
  0xdd   : > { %v873_v44 = vpop.f32.mrf.mxu0 }
  0xde   : > { %v454_v46 = vmax.f32 %v394_v42, 0.0  ;;  %v470_v50 = vpack.c.bf16 %v456_v43, %v455_v47  ;;  %v415_v54 = vadd.f32 %v873_v44, %v815_v36 }
  0xdf   : > { %v406_v48 = vpop.f32.mrf.mxu0 }
  0xe0   : > { %v469_v49 = vpack.c.bf16 %v454_v46, %v453_v45  ;;  %v407_v52 = vadd.f32 %v815_v36, %v406_v48  ;;  %v459_v61 = vmax.f32 %v415_v54, 0.0 }
  0xe1   : > { %v874_v51 = vpop.f32.mrf.mxu0 }
  0xe2   : > { %v418_v53 = vadd.f32 %v874_v51, %v815_v36  ;;  %899 = vmatprep.mubr.bf16.mxu0 %v469_v49  ;;  %v457_v59 = vmax.f32 %v407_v52, 0.0 }
  0xe3   : > { %v409_v55 = vpop.f32.mrf.mxu0  ;;  %900 = vmatmul.mubr.bf16.vlgmr.msra.gmra.mxu0 %v470_v50 }
  0xe4   : > { %v410_v56 = vadd.f32 %v815_v36, %v409_v55  ;;  %v460_v57 = vmax.f32 %v418_v53, 0.0 }
  0xe5   : > { %v877_v58 = vpop.f32.mrf.mxu0 }
  0xe6   : > { %v458_v60 = vmax.f32 %v410_v56, 0.0  ;;  %v472_v0 = vpack.c.bf16 %v460_v57, %v459_v61  ;;  %v431_v4 = vadd.f32 %v877_v58, %v815_v36 }
  0xe7   : > { %v422_v62 = vpop.f32.mrf.mxu0 }
  0xe8   : > { %v471_v63 = vpack.c.bf16 %v458_v60, %v457_v59  ;;  %v423_v2 = vadd.f32 %v815_v36, %v422_v62  ;;  %v463_v11 = vmax.f32 %v431_v4, 0.0 }
  0xe9   : > { %v878_v1 = vpop.f32.mrf.mxu0 }
  0xea   : > { %v434_v3 = vadd.f32 %v878_v1, %v815_v36  ;;  %903 = vmatprep.mubr.bf16.mxu1 %v471_v63  ;;  %v461_v9 = vmax.f32 %v423_v2, 0.0 }
  0xeb   : > { %v425_v5 = vpop.f32.mrf.mxu0  ;;  %904 = vmatmul.mubr.bf16.vlgmr.msra.gmra.mxu1 %v472_v0 }
  0xec   : > { %v426_v6 = vadd.f32 %v815_v36, %v425_v5  ;;  %v464_v7 = vmax.f32 %v434_v3, 0.0 }
  0xed   : > { %v881_v8 = vpop.f32.mrf.mxu0 }
  0xee   : > { %v462_v10 = vmax.f32 %v426_v6, 0.0  ;;  %v474_v14 = vpack.c.bf16 %v464_v7, %v463_v11  ;;  %v447_v18 = vadd.f32 %v881_v8, %v815_v36 }
  0xef   : > { %v438_v12 = vpop.f32.mrf.mxu0 }
  0xf0   : > { %v473_v13 = vpack.c.bf16 %v462_v10, %v461_v9  ;;  %v439_v16 = vadd.f32 %v815_v36, %v438_v12  ;;  %v467_v24 = vmax.f32 %v447_v18, 0.0 }
  0xf1   : > { %v882_v15 = vpop.f32.mrf.mxu0 }
  0xf2   : > { %v450_v17 = vadd.f32 %v882_v15, %v815_v36  ;;  %907 = vmatprep.mubr.bf16.mxu1 %v473_v13  ;;  %v465_v22 = vmax.f32 %v439_v16, 0.0 }
  0xf3   : > { %v441_v19 = vpop.f32.mrf.mxu0  ;;  %908 = vmatmul.mubr.bf16.gmra.mxu1 %v474_v14 }
  0xf4   : > { %v442_v20 = vadd.f32 %v815_v36, %v441_v19  ;;  %v468_v21 = vmax.f32 %v450_v17, 0.0 }
  0xf6   : > { %v466_v23 = vmax.f32 %v442_v20, 0.0  ;;  %v476_v26 = vpack.c.bf16 %v468_v21, %v467_v24 }
  0xf8   : > { %v475_v25 = vpack.c.bf16 %v466_v23, %v465_v22 }
  0xfa   : > { %911 = vmatprep.mubr.bf16.mxu1 %v475_v25 }
  0xfb   : > { %912 = vmatmul.mubr.bf16.gmra.mxu1 %v476_v26 }
 0x1a3   : > { %v901_v33 = vpop.f32.mrf.mxu0 }
 0x1a4   : > { %v591_v34 = vadd.f32 %v901_v33, %v1081_v32 }
 0x1a5   : > { %v582_v36 = vpop.f32.mrf.mxu0 }
 0x1a6   : > { %v647_v37 = vmax.f32 %v591_v34, 0.0  ;;  %v583_v38 = vadd.f32 %v1081_v32, %v582_v36  ;;  %v716_v36 = vstv %s715_s14 }
 0x1a7   : > { %v902_v39 = vpop.f32.mrf.mxu0 }
 0x1a8   : > { %v645_v40 = vmax.f32 %v583_v38, 0.0  ;;  %v594_v41 = vadd.f32 %v902_v39, %v1081_v32  ;;  %v669_v42 = vmul.f32 %v1084_v35, %v647_v37 }
 0x1a9   : > { %v585_v43 = vpop.f32.mrf.mxu0 }
 0x1aa   : > { %v648_v44 = vmax.f32 %v594_v41, 0.0  ;;  %v586_v45 = vadd.f32 %v1081_v32, %v585_v43  ;;  %687 = vadd.xlane.f32.xlu1 %v669_v42  ;;  %v667_v46 = vmul.f32 %v1084_v35, %v645_v40 }
 0x1ab   : > { %v905_v47 = vpop.f32.mrf.mxu1 }
 0x1ac   : > { %v646_v48 = vmax.f32 %v586_v45, 0.0  ;;  %v607_v49 = vadd.f32 %v905_v47, %v1081_v32  ;;  %683 = vadd.xlane.f32.xlu0 %v667_v46  ;;  %v670_v50 = vmul.f32 %v1084_v35, %v648_v44 }
 0x1ad   : > { %v598_v51 = vpop.f32.mrf.mxu1 }
 0x1ae   : > { %v651_v52 = vmax.f32 %v607_v49, 0.0  ;;  %v599_v53 = vadd.f32 %v1081_v32, %v598_v51  ;;  %689 = vadd.xlane.f32.xlu1 %v670_v50  ;;  %v668_v54 = vmul.f32 %v1084_v35, %v646_v48 }
 0x1af   : > { %v906_v55 = vpop.f32.mrf.mxu1 }
 0x1b0   : > { %v610_v56 = vadd.f32 %v906_v55, %v1081_v32  ;;  %685 = vadd.xlane.f32.xlu0 %v668_v54  ;;  %v649_v58 = vmax.f32 %v599_v53, 0.0  ;;  %v673_v61 = vmul.f32 %v1084_v35, %v651_v52 }
 0x1b1   : > { %v601_v57 = vpop.f32.mrf.mxu1 }
 0x1b2   : > { %v652_v59 = vmax.f32 %v610_v56, 0.0  ;;  %v602_v60 = vadd.f32 %v1081_v32, %v601_v57  ;;  %v671_v5 = vmul.f32 %v1084_v35, %v649_v58 }
 0x1b3   : > { %v909_v62 = vpop.f32.mrf.mxu1 }
 0x1b4   : > { %v650_v63 = vmax.f32 %v602_v60, 0.0  ;;  %v623_v0 = vadd.f32 %v909_v62, %v1081_v32  ;;  %695 = vadd.xlane.f32.xlu0 %v673_v61  ;;  %v674_v1 = vmul.f32 %v1084_v35, %v652_v59 }
 0x1b5   : > { %v614_v2 = vpop.f32.mrf.mxu1 }
 0x1b6   : > { %v655_v3 = vmax.f32 %v623_v0, 0.0  ;;  %v615_v4 = vadd.f32 %v1081_v32, %v614_v2  ;;  %697 = vadd.xlane.f32.xlu1 %v674_v1  ;;  %v672_v8 = vmul.f32 %v1084_v35, %v650_v63 }
 0x1b7   : > { %v910_v6 = vpop.f32.mrf.mxu1 }
 0x1b8   : > { %v626_v7 = vadd.f32 %v910_v6, %v1081_v32  ;;  %691 = vadd.xlane.f32.xlu0 %v671_v5  ;;  %v653_v10 = vmax.f32 %v615_v4, 0.0  ;;  %v677_v13 = vmul.f32 %v1084_v35, %v655_v3 }
 0x1b9   : > { %v617_v9 = vpop.f32.mrf.mxu1 }
 0x1ba   : > { %v656_v11 = vmax.f32 %v626_v7, 0.0  ;;  %v618_v12 = vadd.f32 %v1081_v32, %v617_v9  ;;  %693 = vadd.xlane.f32.xlu1 %v672_v8  ;;  %v675_v20 = vmul.f32 %v1084_v35, %v653_v10 }
 0x1bb   : > { %v913_v14 = vpop.f32.mrf.mxu1 }
 0x1bc   : > { %v654_v15 = vmax.f32 %v618_v12, 0.0  ;;  %703 = vadd.xlane.f32.xlu0 %v677_v13  ;;  %v678_v16 = vmul.f32 %v1084_v35, %v656_v11  ;;  %v639_v18 = vadd.f32 %v913_v14, %v1081_v32 }
 0x1bd   : > { %v630_v17 = vpop.f32.mrf.mxu1 }
 0x1be   : > { %v631_v19 = vadd.f32 %v1081_v32, %v630_v17  ;;  %705 = vadd.xlane.f32.xlu1 %v678_v16  ;;  %v676_v23 = vmul.f32 %v1084_v35, %v654_v15  ;;  %v659_v25 = vmax.f32 %v639_v18, 0.0 }
 0x1bf   : > { %v914_v21 = vpop.f32.mrf.mxu1 }
 0x1c0   : > { %v657_v22 = vmax.f32 %v631_v19, 0.0  ;;  %699 = vadd.xlane.f32.xlu0 %v675_v20  ;;  %v642_v26 = vadd.f32 %v914_v21, %v1081_v32  ;;  %v681_v33 = vmul.f32 %v1084_v35, %v659_v25 }
 0x1c1   : > { %v633_v24 = vpop.f32.mrf.mxu1 }
 0x1c2   : > { %v634_v27 = vadd.f32 %v1081_v32, %v633_v24  ;;  %701 = vadd.xlane.f32.xlu1 %v676_v23  ;;  %v679_v28 = vmul.f32 %v1084_v35, %v657_v22  ;;  %v660_v30 = vmax.f32 %v642_v26, 0.0 }
 0x1c4   : > { %v658_v29 = vmax.f32 %v634_v27, 0.0  ;;  %707 = vadd.xlane.f32.xlu0 %v679_v28  ;;  %v682_v34 = vmul.f32 %v1084_v35, %v660_v30 }
 0x1c6   : > { %v680_v31 = vmul.f32 %v1084_v35, %v658_v29 }
 0x1c8   : > { %709 = vadd.xlane.f32.xlu1 %v680_v31  ;;  %711 = vadd.xlane.f32.xlu0 %v681_v33 }
 0x1cc   : > { %713 = vadd.xlane.f32.xlu1 %v682_v34 }
 0x233   : > { %v688_v32 = vpop.xlane.xlu1 %687 }
 0x234   : > { %v719_v37 = vadd.f32 %v716_v36, %v688_v32 }
 0x235   : > { %v684_v38 = vpop.xlane.xlu0 %683 }
 0x236   : > { %736 = vst.msk [vmem:[%s1122_s17 + $0x10] sm:$0xff] %vm733_vm1, %v719_v37  ;;  %v717_v35 = vadd.f32 %v716_v36, %v684_v38 }
 0x237   : > { %v690_v39 = vpop.xlane.xlu1 %689 }
 0x238   : > { %734 = vst.msk [vmem:[%s1122_s17] sm:$0xff] %vm733_vm1, %v717_v35  ;;  %v720_v40 = vadd.f32 %v716_v36, %v690_v39 }
 0x239   : > { %v686_v41 = vpop.xlane.xlu0 %685 }
 0x23a   : > { %737 = vst.msk [vmem:[%s1122_s17 + $0x18] sm:$0xff] %vm733_vm1, %v720_v40  ;;  %v718_v42 = vadd.f32 %v716_v36, %v686_v41 }
 0x23c   : > { %735 = vst.msk [vmem:[%s1122_s17 + $0x8] sm:$0xff] %vm733_vm1, %v718_v42 }
 0x23d   : > { %v696_v43 = vpop.xlane.xlu0 %695 }
 0x23e   : > { %v723_v44 = vadd.f32 %v716_v36, %v696_v43 }
 0x23f   : > { %v698_v45 = vpop.xlane.xlu1 %697 }
 0x240   : > { %740 = vst.msk [vmem:[%s1122_s17 + $0x30] sm:$0xff] %vm733_vm1, %v723_v44  ;;  %v724_v46 = vadd.f32 %v716_v36, %v698_v45 }
 0x241   : > { %v692_v47 = vpop.xlane.xlu0 %691 }
 0x242   : > { %741 = vst.msk [vmem:[%s1122_s17 + $0x38] sm:$0xff] %vm733_vm1, %v724_v46  ;;  %v721_v48 = vadd.f32 %v716_v36, %v692_v47 }
 0x243   : > { %v694_v49 = vpop.xlane.xlu1 %693 }
 0x244   : > { %738 = vst.msk [vmem:[%s1122_s17 + $0x20] sm:$0xff] %vm733_vm1, %v721_v48  ;;  %v722_v50 = vadd.f32 %v716_v36, %v694_v49 }
 0x245   : > { %v704_v51 = vpop.xlane.xlu0 %703 }
 0x246   : > { %739 = vst.msk [vmem:[%s1122_s17 + $0x28] sm:$0xff] %vm733_vm1, %v722_v50  ;;  %v727_v52 = vadd.f32 %v716_v36, %v704_v51 }
 0x247   : > { %v706_v53 = vpop.xlane.xlu1 %705 }
 0x248   : > { %744 = vst.msk [vmem:[%s1122_s17 + $0x50] sm:$0xff] %vm733_vm1, %v727_v52  ;;  %v728_v54 = vadd.f32 %v716_v36, %v706_v53 }
 0x249   : > { %v700_v55 = vpop.xlane.xlu0 %699 }
 0x24a   : > { %745 = vst.msk [vmem:[%s1122_s17 + $0x58] sm:$0xff] %vm733_vm1, %v728_v54  ;;  %v725_v56 = vadd.f32 %v716_v36, %v700_v55 }
 0x24b   : > { %v702_v57 = vpop.xlane.xlu1 %701 }
 0x24c   : > { %742 = vst.msk [vmem:[%s1122_s17 + $0x40] sm:$0xff] %vm733_vm1, %v725_v56  ;;  %v726_v58 = vadd.f32 %v716_v36, %v702_v57 }
 0x24d   : > { %v708_v59 = vpop.xlane.xlu0 %707 }
 0x24e   : > { %743 = vst.msk [vmem:[%s1122_s17 + $0x48] sm:$0xff] %vm733_vm1, %v726_v58  ;;  %v729_v60 = vadd.f32 %v716_v36, %v708_v59 }
 0x250   : > { %746 = vst.msk [vmem:[%s1122_s17 + $0x60] sm:$0xff] %vm733_vm1, %v729_v60 }
 0x251   : > { %v710_v61 = vpop.xlane.xlu1 %709  ;;  %v712_v62 = vpop.xlane.xlu0 %711 }
 0x252   : > { %v730_v63 = vadd.f32 %v716_v36, %v710_v61  ;;  %v731_v0 = vadd.f32 %v716_v36, %v712_v62 }
 0x254   : > { %747 = vst.msk [vmem:[%s1122_s17 + $0x68] sm:$0xff] %vm733_vm1, %v730_v63  ;;  %748 = vst.msk [vmem:[%s1122_s17 + $0x70] sm:$0xff] %vm733_vm1, %v731_v0 }
 0x255   : > { %v714_v1 = vpop.xlane.xlu1 %713 }
 0x256   : > { %v732_v2 = vadd.f32 %v716_v36, %v714_v1 }
 0x258   : > { %749 = vst.msk [vmem:[%s1122_s17 + $0x78] sm:$0xff] %vm733_vm1, %v732_v2 }
 0x259 PF: > { %s18_s26 = sadd.s32 1, %s955_s26  }
 0x25a   : > { %p15_p4 = scmp.ge.s32.totalorder %s18_s26, 4  }
 0x25c   :  { %17 = sbr.rel (!%p15_p4) target bundleno = 2 (0x2), region = 78 }

</bundles_post_ra>
